<compile_context>
chip_gen: v5e
topology: v5e:2x2
jax: 0.10.0
libtpu: 0.0.40
codegen_flags: <defaults>
</compile_context>

<pallas_src>
import functools
import math

import jax
import jax.numpy as jnp
from jax.experimental import pallas as pl
from jax.experimental.pallas import tpu as pltpu

EPS = 1e-5

# Per-tile byte budget for the streamed input tile (output tile is the same
# size).  Double-buffered in + out  =>  ~4x this resident in VMEM, well under
# the explicit scoped limit below (physical VMEM: 128 MiB v5e/v6e, 64 MiB v7x).
_TILE_BYTES = 4 * 1024 * 1024
_VMEM_LIMIT_BYTES = 32 * 1024 * 1024


def _round_up(a, b):
    return ((a + b - 1) // b) * b


def _norm_obs_kernel(x_ref, mean_ref, inv_std_ref, out_ref, nan_ref, *,
                     clamp_value, rows, total_lanes, block_rows, block_lanes,
                     need_row_mask, need_lane_mask):
    x = x_ref[...].astype(jnp.float32)                   # (block_rows, block_lanes)
    y = (x - mean_ref[...]) * inv_std_ref[...]           # (1, lanes) params broadcast
    out_ref[...] = jnp.clip(y, -clamp_value, clamp_value).astype(out_ref.dtype)

    # NaN check on the pre-clip normalized value: NaN in obs / mean / var
    # propagates through subtract & multiply, covering both PyTorch-side checks.
    nan_m = y != y                                       # bool (block_rows, block_lanes)

    def _reduce(mask):
        # Cast only the reduced (1, lanes) result (cheap on the VPU).
        nan_ref[0] = jnp.any(mask, axis=0, keepdims=True).astype(jnp.int32)

    edge_conds = []
    if need_row_mask:
        edge_conds.append(pl.program_id(0) == pl.num_programs(0) - 1)
    if need_lane_mask:
        edge_conds.append(pl.program_id(1) == pl.num_programs(1) - 1)

    if edge_conds:
        is_edge = functools.reduce(jnp.logical_or, edge_conds)

        @pl.when(is_edge)
        def _():
            # Mask out-of-bounds rows/lanes of the ragged trailing blocks: their
            # input data is undefined and their output writes are dropped, but
            # they must not poison the NaN flag.
            m = nan_m
            if need_row_mask:
                gr = (jax.lax.broadcasted_iota(jnp.int32, nan_m.shape, 0)
                      + pl.program_id(0) * block_rows)
                m = jnp.logical_and(m, gr < rows)
            if need_lane_mask:
                gl = (jax.lax.broadcasted_iota(jnp.int32, nan_m.shape, 1)
                      + pl.program_id(1) * block_lanes)
                m = jnp.logical_and(m, gl < total_lanes)
            _reduce(m)

        @pl.when(jnp.logical_not(is_edge))
        def _():
            _reduce(nan_m)
    else:
        _reduce(nan_m)


def norm_obs_base_forward(obs, running_mean, running_var, clamp_value=5.0, eps=EPS):
    """Pallas implementation of NormObsBase.forward (normalize_obs=True, eval mode).

    Args:
      obs:          (B, num_in) observations.
      running_mean: (num_in,)   running mean of RunningMeanStd.
      running_var:  (num_in,)   running variance of RunningMeanStd.
    Returns:
      (normalized_obs of shape (B, num_in), nan_flag: scalar bool array)
    """
    B, D = obs.shape
    itemsize = jnp.dtype(obs.dtype).itemsize

    # Lane-dense repack: L = lcm(D, 128), so each slab row holds exactly k
    # observations and every load/store is a full-lane, unmasked vreg access.
    # Element (r, c) of the slab is obs[r*k + c//D, c % D].
    L = D * (128 // math.gcd(D, 128))
    k = L // D
    rows = pl.cdiv(B, k)

    # Lane tiling only kicks in when even a minimum 8-row full-width tile would
    # exceed the byte budget (very large / odd D) -- keeps VMEM usage bounded.
    max_block_L = max(128, (_TILE_BYTES // (8 * itemsize)) // 128 * 128)
    block_L = L if L <= max_block_L else max_block_L
    grid_c = pl.cdiv(L, block_L)
    need_lane_mask = (L % block_L) != 0

    # Row tile: driven by the byte budget (multiple of 8), but clamped so large
    # batches still produce >=4 grid steps (both v7x TCs busy, pipeline primed).
    budget_rows = max(8, (_TILE_BYTES // (block_L * itemsize)) // 8 * 8)
    desired_rows = _round_up(pl.cdiv(rows, 4), 8)
    block_rows = min(budget_rows, desired_rows)
    if block_rows >= rows:
        block_rows = rows          # single full-extent row block (always legal)
    grid_r = pl.cdiv(rows, block_rows)
    need_row_mask = (rows % block_rows) != 0

    # Repack input.  Fast path (B % k == 0): pure metadata reshape, zero copies.
    if B % k == 0:
        x = obs.reshape(rows, L)
    else:
        x = jnp.pad(obs, ((0, rows * k - B), (0, 0))).reshape(rows, L)

    # Tiny (1, L) parameter slabs; inv_std precomputed once outside the kernel.
    mean_l = jnp.tile(running_mean.astype(jnp.float32).reshape(1, D), (1, k))
    inv_std = 1.0 / jnp.sqrt(running_var.astype(jnp.float32) + eps)
    inv_std_l = jnp.tile(inv_std.reshape(1, D), (1, k))

    kernel = functools.partial(
        _norm_obs_kernel,
        clamp_value=float(clamp_value),
        rows=rows, total_lanes=L,
        block_rows=block_rows, block_lanes=block_L,
        need_row_mask=need_row_mask, need_lane_mask=need_lane_mask)

    out, nan_blocks = pl.pallas_call(
        kernel,
        out_shape=(
            jax.ShapeDtypeStruct((rows, L), obs.dtype),
            jax.ShapeDtypeStruct((grid_r * grid_c, 1, block_L), jnp.int32),
        ),
        grid_spec=pltpu.PrefetchScalarGridSpec(
            num_scalar_prefetch=0,
            grid=(grid_r, grid_c),
            in_specs=[
                pl.BlockSpec((block_rows, block_L), lambda i, j: (i, j)),   # obs tile
                pl.BlockSpec((1, block_L), lambda i, j: (0, j)),            # tiled mean
                pl.BlockSpec((1, block_L), lambda i, j: (0, j)),            # tiled 1/std
            ],
            out_specs=(
                pl.BlockSpec((block_rows, block_L), lambda i, j: (i, j)),   # normalized obs
                pl.BlockSpec((1, 1, block_L),
                             lambda i, j: (i * grid_c + j, 0, 0)),          # per-step NaN flag
            ),
        ),
        compiler_params=pltpu.CompilerParams(
            dimension_semantics=("parallel", "parallel"),   # steps fully independent
            vmem_limit_bytes=_VMEM_LIMIT_BYTES,
        ),
        cost_estimate=pl.CostEstimate(
            flops=6 * rows * L,
            transcendentals=0,
            bytes_accessed=2 * rows * L * itemsize,
        ),
    )(x, mean_l, inv_std_l)

    out = out.reshape(rows * k, D)
    if rows * k != B:
        out = out[:B]
    nan_flag = jnp.any(nan_blocks != 0)
    return out, nan_flag


if __name__ == "__main__":
    # Small shapes consistent with the module: num_in = num_out = 32, batch = 8.
    B, NUM_IN = 8, 32
    CLAMP_VALUE = 5.0  # config.norm_clamp_value

    key = jax.random.PRNGKey(0)
    k_obs, k_mean, k_var = jax.random.split(key, 3)

    obs = jax.random.normal(k_obs, (B, NUM_IN), dtype=jnp.float32) * 3.0 + 1.0
    # Deterministic synthetic RunningMeanStd state (not loaded from checkpoint).
    running_mean = jax.random.normal(k_mean, (NUM_IN,), dtype=jnp.float32) * 0.5
    running_var = jax.nn.softplus(jax.random.normal(k_var, (NUM_IN,), dtype=jnp.float32)) + 0.1

    out, nan_flag = norm_obs_base_forward(obs, running_mean, running_var,
                                          clamp_value=CLAMP_VALUE)
    out = jax.block_until_ready(out)
    nan_flag = jax.block_until_ready(nan_flag)

    if bool(nan_flag):
        raise ValueError("NaN in obs")

    # Reference check against plain-JAX semantics of RunningMeanStd.normalize.
    ref = jnp.clip((obs - running_mean[None, :]) / jnp.sqrt(running_var[None, :] + EPS),
                   -CLAMP_VALUE, CLAMP_VALUE)
    assert out.shape == (B, NUM_IN)
    assert jnp.allclose(out, ref, atol=1e-5, rtol=1e-5), "mismatch vs reference"

    print("KERNEL_OK")
</pallas_src>

<mosaic_0001>
module attributes {stable_mosaic.version = 11 : i64} {
  func.func @_norm_obs_kernel(%arg0: i32, %arg1: i32, %arg2: memref<2x128xf32, #tpu.memory_space<vmem>>, %arg3: memref<1x128xf32, #tpu.memory_space<vmem>>, %arg4: memref<1x128xf32, #tpu.memory_space<vmem>>, %arg5: memref<2x128xf32, #tpu.memory_space<vmem>>, %arg6: memref<1x1x128xi32, #tpu.memory_space<vmem>>) attributes {dimension_semantics = [#tpu.dimension_semantics<parallel>, #tpu.dimension_semantics<parallel>], iteration_bounds = array<i64: 1, 1>, scalar_prefetch = 0 : i64, scratch_operands = 0 : i64, tpu.core_type = #tpu.core_type<tc>, window_params = [{transform_indices = @transform_0, window_bounds = array<i64: 2, 128>}, {transform_indices = @transform_1, window_bounds = array<i64: 1, 128>}, {transform_indices = @transform_2, window_bounds = array<i64: 1, 128>}, {transform_indices = @transform_3, window_bounds = array<i64: 2, 128>}, {transform_indices = @transform_4, window_bounds = array<i64: 1, 1, 128>}]} {
    %c0 = arith.constant 0 : index
    %c0_0 = arith.constant 0 : index
    %0 = vector.load %arg2[%c0, %c0_0] : memref<2x128xf32, #tpu.memory_space<vmem>>, vector<2x128xf32>
    %c0_1 = arith.constant 0 : index
    %c0_2 = arith.constant 0 : index
    %1 = vector.load %arg3[%c0_1, %c0_2] : memref<1x128xf32, #tpu.memory_space<vmem>>, vector<1x128xf32>
    %2 = vector.broadcast %1 : vector<1x128xf32> to vector<2x128xf32>
    %3 = arith.subf %0, %2 : vector<2x128xf32>
    %c0_3 = arith.constant 0 : index
    %c0_4 = arith.constant 0 : index
    %4 = vector.load %arg4[%c0_3, %c0_4] : memref<1x128xf32, #tpu.memory_space<vmem>>, vector<1x128xf32>
    %5 = vector.broadcast %4 : vector<1x128xf32> to vector<2x128xf32>
    %6 = arith.mulf %3, %5 : vector<2x128xf32>
    %cst = arith.constant -5.000000e+00 : f32
    %cst_5 = arith.constant 5.000000e+00 : f32
    %7 = vector.broadcast %cst : f32 to vector<2x128xf32>
    %8 = arith.maximumf %7, %6 : vector<2x128xf32>
    %9 = vector.broadcast %cst_5 : f32 to vector<2x128xf32>
    %10 = arith.minimumf %9, %8 : vector<2x128xf32>
    %c0_6 = arith.constant 0 : index
    %c0_7 = arith.constant 0 : index
    %11 = vector.load %arg5[%c0_6, %c0_7] : memref<2x128xf32, #tpu.memory_space<vmem>>, vector<2x128xf32>
    tpu.vector_store %arg5[%c0_6, %c0_7], %10 {strides = array<i32>} : memref<2x128xf32, #tpu.memory_space<vmem>>, vector<2x128xf32>,
    %12 = arith.cmpf one, %6, %6 : vector<2x128xf32>
    %cst_8 = arith.constant 1.000000e+00 : f32
    %cst_9 = arith.constant 0.000000e+00 : f32
    %13 = vector.broadcast %cst_8 : f32 to vector<2x128xf32>
    %14 = vector.broadcast %cst_9 : f32 to vector<2x128xf32>
    %15 = arith.select %12, %13, %14 : vector<2x128xi1>, vector<2x128xf32>
    %cst_10 = arith.constant dense<0xFF800000> : vector<128xf32>
    %16 = vector.multi_reduction <maximumf>, %15, %cst_10 [0] : vector<2x128xf32> to vector<128xf32>
    %cst_11 = arith.constant 0.000000e+00 : f32
    %17 = vector.broadcast %cst_11 : f32 to vector<128xf32>
    %18 = arith.cmpf ogt, %16, %17 : vector<128xf32>
    %19 = vector.shape_cast %18 : vector<128xi1> to vector<1x128xi1>
    %20 = arith.extui %19 : vector<1x128xi1> to vector<1x128xi32>
    %c0_12 = arith.constant 0 : index
    %c0_13 = arith.constant 0 : index
    %c0_14 = arith.constant 0 : index
    %21 = vector.load %arg6[%c0_12, %c0_13, %c0_14] : memref<1x1x128xi32, #tpu.memory_space<vmem>>, vector<1x1x128xi32>
    %22 = vector.shape_cast %21 : vector<1x1x128xi32> to vector<1x128xi32>
    %23 = vector.shape_cast %20 : vector<1x128xi32> to vector<1x1x128xi32>
    tpu.vector_store %arg6[%c0_12, %c0_13, %c0_14], %23 {strides = array<i32>} : memref<1x1x128xi32, #tpu.memory_space<vmem>>, vector<1x1x128xi32>,
    return
  }
  func.func @transform_0(%arg0: i32, %arg1: i32) -> (i32, i32) {
    %c0_i32 = arith.constant 0 : i32
    return %arg0, %arg1 : i32, i32
  }
  func.func @transform_1(%arg0: i32, %arg1: i32) -> (i32, i32) {
    %c0_i32 = arith.constant 0 : i32
    %c0_i32_0 = arith.constant 0 : i32
    return %c0_i32, %arg1 : i32, i32
  }
  func.func @transform_2(%arg0: i32, %arg1: i32) -> (i32, i32) {
    %c0_i32 = arith.constant 0 : i32
    %c0_i32_0 = arith.constant 0 : i32
    return %c0_i32, %arg1 : i32, i32
  }
  func.func @transform_3(%arg0: i32, %arg1: i32) -> (i32, i32) {
    %c0_i32 = arith.constant 0 : i32
    return %arg0, %arg1 : i32, i32
  }
  func.func @transform_4(%arg0: i32, %arg1: i32) -> (i32, i32, i32) {
    %c1_i32 = arith.constant 1 : i32
    %0 = arith.muli %arg0, %c1_i32 : i32
    %1 = arith.addi %0, %arg1 : i32
    %c0_i32 = arith.constant 0 : i32
    %c0_i32_0 = arith.constant 0 : i32
    %c0_i32_1 = arith.constant 0 : i32
    return %1, %c0_i32, %c0_i32_0 : i32, i32, i32
  }
}

</mosaic_0001>

<bundles_post_ra>
// kernel: tpu_custom_call.1
= control target key start
LH: loop header
LB: loop body
LE: loop exit
PB: predicated region body
PF: predicated region fallthrough
CT: control target
= control target key end

     0   :  { %10 = vsyncpa [#allocation3], 0  ;;  %s269_s0 = inlined_call_operand.hbm [shape: f32[2,128], index: 0, kind: input, shape index: {}]   ;;  %s270_s1 = inlined_call_operand.hbm [shape: f32[1,128], index: 1, kind: input, shape index: {}]   ;;  %s271_s2 = inlined_call_operand.vmem [shape: f32[1,128], index: 2, kind: input, shape index: {}]   ;;  %s272_s3 = inlined_call_operand.hbm [shape: f32[2,128], index: 3, kind: output, shape index: {0}]   ;;  %s273_s4 = inlined_call_operand.hbm [shape: s32[1,1,128], index: 4, kind: output, shape index: {1}]  }
   0x1   :  { %11 = vsyncpa [#allocation6], 0 }
   0x2   :  { %12 = vsyncpa [#allocation4], 0 }
   0x3   :  { %13 = vsyncpa [#allocation9], 0  ;;  %s19_s17 = sshll.u32 %s269_s0, 4  ;;  %s223_s18 = smov [#allocation2]   ;;  %s20_s17 = int_to_ptr.hbm [resolvable:$true] %s19_s17 }
   0x4   :  { %s21_s19 = sshll.u32 %s223_s18, 4  ;;  %s30_s22 = sshll.u32 %s270_s1, 4  ;;  %s22_s19 = int_to_ptr.vmem [resolvable:$true] %s21_s19  ;;  %s31_s22 = int_to_ptr.hbm [resolvable:$true] %s30_s22 }
   0x5   :  { %24 = dma.hbm_to_vmem [thread:$0]  %s20_s17, 32, %s22_s19, [#allocation3]  }
   0x6   :  { %s224_s23 = smov [#allocation5]  }
   0x7   :  { %s32_s24 = sshll.u32 %s224_s23, 4  ;;  %s33_s24 = int_to_ptr.vmem [resolvable:$true] %s32_s24 }
   0x8   :  { %35 = dma.hbm_to_vmem [thread:$0]  %s31_s22, 16, %s33_s24, [#allocation6]  }
   0x9   :  { %215 = dma.done.wait [#allocation3], 32  }
   0xa   :  { %216 = vsyncadd [#allocation3], 4294967264 }
   0xb   :  { %217 = dma.done.wait [#allocation6], 16  }
   0xc   :  { %218 = vsyncadd [#allocation6], 4294967280  ;;  %v47_v0 = vld [vmem:[#allocation2] sm:$0x3]  ;;  %v117_v1 = vld [vmem:[#allocation5] ss:$0 sm:$0xff] }
   0xd   :  { %v118_v2 = vld [vmem:[%s271_s2] ss:$0 sm:$0xff]  ;;  %v52_v3 = vsub.f32 %v47_v0, %v117_v1  ;;  %s225_s26 = smov [#allocation7]   ;;  %s81_s29 = sshll.u32 %s272_s3, 4  ;;  %vm63_vm0 = vcmask 1041408   ;;  %v226_v6 = vmov 0.0   ;;  %s82_s29 = int_to_ptr.hbm [resolvable:$true] %s81_s29 }
   0xe   :  { %s79_s27 = sshll.u32 %s225_s26, 4  ;;  %s227_s2 = smov [#allocation8]   ;;  %v228_v15 = vmov 0   ;;  %s80_s27 = int_to_ptr.vmem [resolvable:$true] %s79_s27 }
   0xf   :  { %v57_v4 = vmul.f32 %v118_v2, %v52_v3  ;;  %s92_s30 = sshll.u32 %s227_s2, 4  ;;  %s94_s6 = sshll.u32 %s273_s4, 4  ;;  %s93_s30 = int_to_ptr.vmem [resolvable:$true] %s92_s30  ;;  %s95_s6 = int_to_ptr.hbm [resolvable:$true] %s94_s6 }
  0x11   :  { %v110_v5 = vclamps-f32 %v57_v4, 5.0  ;;  %vm61_vm1 = vcmp.ne.f32.partialorder %v57_v4, %v57_v4 }
  0x12   :  { %v62_v7 = vsel %vm61_vm1, 1.0, %v226_v6 }
  0x13   :  { %60 = vst [vmem:[#allocation7] sm:$0x3] %v110_v5  ;;  %v64_v8 = vsel %vm63_vm0, %v62_v7, -inf }
  0x14   :  { %v65_v9 = vrot.slane %v64_v8, 4  ;;  %84 = dma.vmem_to_hbm [thread:$0]  %s80_s27, 32, %s82_s29, [#allocation4]  }
  0x16   :  { %v66_v10 = vmax.f32 %v64_v8, %v65_v9 }
  0x18   :  { %v67_v11 = vrot.slane %v66_v10, 2 }
  0x1a   :  { %v68_v12 = vmax.f32 %v66_v10, %v67_v11 }
  0x1c   :  { %v69_v13 = vrot.slane %v68_v12, 1 }
  0x1e   :  { %v70_v14 = vmax.f32 %v68_v12, %v69_v13 }
  0x20   :  { %vm71_vm2 = vcmp.gt.f32.partialorder %v70_v14, 0.0 }
  0x21   :  { %v72_v16 = vsel %vm71_vm2, 1, %v228_v15 }
  0x22   :  { %73 = vst [vmem:[#allocation8] sm:$0x1] %v72_v16 }
  0x23   :  { %97 = dma.vmem_to_hbm [thread:$0]  %s93_s30, 16, %s95_s6, [#allocation9]  }
  0x24   :  { %219 = dma.done.wait [#allocation4], 32  }
  0x25   :  { %220 = vsyncadd [#allocation4], 4294967264 }
  0x26   :  { %221 = dma.done.wait [#allocation9], 16  }
  0x27   :  { %222 = vsyncadd [#allocation9], 4294967280 }
  0x28   :  { %106 = vsyncpa [#allocation3], 1 }
  0x29   :  { %107 = vsyncpa [#allocation6], 1 }
  0x2a   :  { %108 = vsyncpa [#allocation4], 1 }
  0x2b   :  { %109 = vsyncpa [#allocation9], 1 }

</bundles_post_ra>
